<compile_context>
chip_gen: v7x
topology: tpu7x:2x2x1
jax: 0.10.0
libtpu: 0.0.40
codegen_flags: <defaults>
</compile_context>

<pallas_src>
import jax
import jax.numpy as jnp
from jax.experimental import pallas as pl
from jax.experimental.pallas import tpu as pltpu


def _make_edge_loss_kernel(H_img, W_img, Hp):
    """Closure over static per-image height/width and the padded row period."""

    def kernel(x_ref, t_ref, acc_ref, mask_ref):
        step = pl.program_id(1)              # reduction ("arbitrary") axis
        rows, Wc = x_ref.shape

        @pl.when(step == 0)
        def _init():
            acc_ref[...] = jnp.zeros_like(acc_ref)
            # 'valid' 3x3 conv => only interior pixels of each H_img x W_img
            # image contribute.  Built once per chunk, applied each step with
            # one multiply (instead of iota/mod/cmp/select per element/step).
            r = jax.lax.broadcasted_iota(jnp.int32, (rows, Wc), 0) % Hp
            c = jax.lax.broadcasted_iota(jnp.int32, (rows, Wc), 1) % W_img
            valid = ((r > 0) & (r < H_img - 1) & (c > 0) & (c < W_img - 1))
            mask_ref[...] = valid.astype(jnp.float32)

        # pltpu.roll (XLU, free slot next to the VALU bottleneck) on native
        # (8,128)-aligned tiles; slice+concat fallback for unaligned widths.
        aligned = (rows % 8 == 0) and (Wc % 128 == 0)

        def neighbors(v, axis):
            if aligned:
                return (pltpu.roll(v, 1, axis=axis),
                        pltpu.roll(v, v.shape[axis] - 1, axis=axis))
            return jnp.roll(v, 1, axis=axis), jnp.roll(v, -1, axis=axis)

        def grad_mag(ref):
            # Rolls in the storage dtype (half the vreg/XLU bytes for bf16);
            # upcast at the subtraction.  One input is fully reduced to its
            # f32 gradient magnitude before the other is touched.
            v = ref[...]
            left, right = neighbors(v, 1)          # v[r, c-1], v[r, c+1]
            gx = left.astype(jnp.float32) - right.astype(jnp.float32)
            up, down = neighbors(v, 0)             # v[r-1, c], v[r+1, c]
            gy = up.astype(jnp.float32) - down.astype(jnp.float32)
            return jnp.sqrt(gx * gx + gy * gy)     # sign of the shift is irrelevant

        d = grad_mag(x_ref) - grad_mag(t_ref)
        ad = jnp.abs(d)
        elem = jnp.where(ad < 1.0, 0.5 * d * d, ad - 0.5)     # SmoothL1, beta=1
        # Every wrap-around / cross-image / padded-row value introduced by the
        # shifts lands only on masked border rows/columns.
        elem = elem * mask_ref[...]

        # Fold the block into an (8, Wc) partial sum with pure VPU adds.
        # 4 independent chains keep the fold out of a rows/8-long serial
        # dependency; the single cross-lane reduction happens in the wrapper.
        m = rows // 8                                # rows is always 8-aligned
        part3 = elem.reshape(m, 8, Wc)
        if m >= 8:
            b0, b1, b2 = m // 4, m // 2, (3 * m) // 4
            partial = ((part3[:b0].sum(axis=0) + part3[b0:b1].sum(axis=0))
                       + (part3[b1:b2].sum(axis=0) + part3[b2:].sum(axis=0)))
        else:
            partial = part3.sum(axis=0)
        acc_ref[...] += partial[None]

    return kernel


def _vmem_budget():
    """(per-input block budget in f32-equivalent bytes, vmem_limit_bytes).

    Sized per generation: v5e/v6e have 128 MiB physical VMEM, v7x only 64 MiB,
    so the v7x plan keeps (2 inputs x 2 pipeline buffers x block) + mask +
    in-kernel f32 temporaries well under ~48 MiB.
    """
    vmem = None
    try:
        vmem = getattr(pltpu.get_tpu_info(), "vmem_capacity_bytes", None)
    except Exception:
        vmem = None
    if vmem is None:
        vmem = 64 << 20                      # assume the small (v7x) budget
    if vmem >= (100 << 20):                  # v5e / v6e
        return 4 << 20, 64 << 20
    return 3 << 20, 48 << 20                 # v7x


def _plan_blocks(n_groups, Hp, Wc, max_block_f32_bytes):
    """Pick (n_chunks, groups_per_step, steps_per_chunk) for a canvas of
    n_groups stacked row-groups of Hp rows x Wc cols."""
    w_pad = ((Wc + 127) // 128) * 128        # lanes pad to 128 in VMEM
    per_group_f32 = Hp * w_pad * 4
    bn_cap = max(1, max_block_f32_bytes // per_group_f32)

    # Two chunks let v7x's two TensorCores each take half the batch; on
    # v5e/v6e (one TC) the extra parallel axis just loops -- harmless.
    chunk_options = (2, 1) if (n_groups >= 2 and n_groups % 2 == 0) else (1,)
    for n_chunks in chunk_options:
        per_chunk = n_groups // n_chunks
        best = 0
        for d in range(1, min(per_chunk, bn_cap) + 1):
            if per_chunk % d == 0:           # Hp is 8-aligned, so any d is legal
                best = d
        if best:
            return n_chunks, best, per_chunk // best
    return 1, 1, n_groups                    # unreachable: d = 1 always valid


def edge_loss(logits, targets, *, max_block_f32_bytes=None, vmem_limit_bytes=None):
    """Pallas implementation of edge_loss.forward.

    logits, targets: (N, 1, H, W) arrays (NCHW, single channel, as implied by
    the (1,1,3,3) conv weights).  Returns a scalar float32 loss.
    """
    N, C, H, W = logits.shape
    assert C == 1, "edge_loss uses single-channel 3x3 conv kernels"
    assert targets.shape == logits.shape

    blk_default, lim_default = _vmem_budget()
    if max_block_f32_bytes is None:
        max_block_f32_bytes = blk_default
    if vmem_limit_bytes is None:
        vmem_limit_bytes = lim_default

    x = logits.reshape(N, H, W)
    t = targets.reshape(N, H, W)

    # Pad per-image height to a multiple of 8 (padded rows are masked) so block
    # rows are always sublane-aligned -- no whole-canvas fallback for odd H.
    Hp = ((H + 7) // 8) * 8
    if Hp != H:
        pad = ((0, 0), (0, Hp - H), (0, 0))
        x = jnp.pad(x, pad)
        t = jnp.pad(t, pad)

    # Lane-dense packing: with W << 128 every vreg / DMA would be W/128
    # utilised, so pack k images side-by-side along the lane axis (one extra
    # HBM pass in the wrapper).  Segment borders stay masked in the kernel.
    k = 1
    if W < 128 and N > 1:
        for cand in range(min(N, max(1, 128 // W)), 1, -1):
            if N % cand == 0:
                k = cand
                break
    n_groups = N // k
    Wc = k * W
    if k > 1:
        x = x.reshape(n_groups, k, Hp, W).transpose(0, 2, 1, 3)
        t = t.reshape(n_groups, k, Hp, W).transpose(0, 2, 1, 3)
    canvas_x = x.reshape(n_groups * Hp, Wc)
    canvas_t = t.reshape(n_groups * Hp, Wc)

    n_chunks, bn, steps = _plan_blocks(n_groups, Hp, Wc, max_block_f32_bytes)
    rows = bn * Hp

    in_spec = pl.BlockSpec((rows, Wc), lambda c, s: (c * steps + s, 0))
    itemsize = jnp.dtype(logits.dtype).itemsize
    cost = pl.CostEstimate(
        flops=30 * N * Hp * W,
        transcendentals=2 * N * Hp * W,
        bytes_accessed=2 * N * Hp * W * itemsize + n_chunks * 8 * Wc * 4,
    )

    partials = pl.pallas_call(
        _make_edge_loss_kernel(H, W, Hp),
        out_shape=jax.ShapeDtypeStruct((n_chunks, 8, Wc), jnp.float32),
        grid=(n_chunks, steps),
        in_specs=[in_spec, in_spec],
        # One (8, Wc) accumulator per chunk; the block index depends only on
        # the parallel axis, so it stays VMEM-resident across the reduction.
        out_specs=pl.BlockSpec((1, 8, Wc), lambda c, s: (c, 0, 0)),
        scratch_shapes=[pltpu.VMEM((rows, Wc), jnp.float32)],   # border mask
        compiler_params=pltpu.CompilerParams(
            dimension_semantics=("parallel", "arbitrary"),
            vmem_limit_bytes=vmem_limit_bytes,
        ),
        cost_estimate=cost,
    )(canvas_x, canvas_t)

    n_valid = N * (H - 2) * (W - 2)
    return jnp.sum(partials) / jnp.float32(n_valid)


if __name__ == "__main__":
    key = jax.random.PRNGKey(0)
    k1, k2 = jax.random.split(key)
    N, C, H, W = 2, 1, 16, 16
    logits = jax.random.normal(k1, (N, C, H, W), dtype=jnp.float32)
    targets = jax.random.normal(k2, (N, C, H, W), dtype=jnp.float32)

    loss = edge_loss(logits, targets)
    jax.block_until_ready(loss)

    # Pure-JAX reference (same math as the PyTorch module).
    def ref(lg, tg):
        def gmag(v):
            v = v[:, 0]
            gx = v[:, 1:H - 1, 0:W - 2] - v[:, 1:H - 1, 2:W]
            gy = v[:, 0:H - 2, 1:W - 1] - v[:, 2:H, 1:W - 1]
            return jnp.sqrt(gx * gx + gy * gy)
        d = gmag(lg) - gmag(tg)
        ad = jnp.abs(d)
        return jnp.mean(jnp.where(ad < 1.0, 0.5 * d * d, ad - 0.5))

    expected = ref(logits, targets)
    assert jnp.allclose(loss, expected, rtol=1e-5, atol=1e-6), (loss, expected)
    print("KERNEL_OK")
</pallas_src>

<mosaic_0001>
module attributes {stable_mosaic.version = 11 : i64} {
  func.func @kernel(%arg0: i32, %arg1: i32, %arg2: memref<16x32xf32, #tpu.memory_space<vmem>>, %arg3: memref<16x32xf32, #tpu.memory_space<vmem>>, %arg4: memref<1x8x32xf32, #tpu.memory_space<vmem>>, %arg5: memref<16x32xf32, #tpu.memory_space<vmem>>) attributes {dimension_semantics = [#tpu.dimension_semantics<parallel>, #tpu.dimension_semantics<arbitrary>], iteration_bounds = array<i64: 1, 1>, scalar_prefetch = 0 : i64, scratch_operands = 1 : i64, tpu.core_type = #tpu.core_type<tc>, window_params = [{transform_indices = @transform_0, window_bounds = array<i64: 16, 32>}, {transform_indices = @transform_1, window_bounds = array<i64: 16, 32>}, {transform_indices = @transform_2, window_bounds = array<i64: 1, 8, 32>}]} {
    %c0_i32 = arith.constant 0 : i32
    %0 = arith.cmpi eq, %arg1, %c0_i32 : i32
    %1 = arith.extui %0 : i1 to i32
    %c0_i32_0 = arith.constant 0 : i32
    %2 = arith.cmpi ne, %1, %c0_i32_0 : i32
    scf.if %2 {
      %cst_15 = arith.constant 0.000000e+00 : f32
      %59 = vector.broadcast %cst_15 : f32 to vector<1x8x32xf32>
      %c0_16 = arith.constant 0 : index
      %c0_17 = arith.constant 0 : index
      %c0_18 = arith.constant 0 : index
      %60 = vector.load %arg4[%c0_16, %c0_17, %c0_18] : memref<1x8x32xf32, #tpu.memory_space<vmem>>, vector<1x8x32xf32>
      tpu.vector_store %arg4[%c0_16, %c0_17, %c0_18], %59 {strides = array<i32>} : memref<1x8x32xf32, #tpu.memory_space<vmem>>, vector<1x8x32xf32>,
      %61 = tpu.iota {dimensions = array<i32: 0>} : vector<16x32xi32>
      %c16_i32 = arith.constant 16 : i32
      %c0_i32_19 = arith.constant 0 : i32
      %62 = arith.cmpi eq, %c16_i32, %c0_i32_19 : i32
      %c1_i32 = arith.constant 1 : i32
      %63 = arith.select %62, %c1_i32, %c16_i32 : i32
      %64 = vector.broadcast %63 : i32 to vector<16x32xi32>
      %65 = arith.remsi %61, %64 : vector<16x32xi32>
      %c0_i32_20 = arith.constant 0 : i32
      %66 = vector.broadcast %c0_i32_20 : i32 to vector<16x32xi32>
      %67 = arith.cmpi ne, %65, %66 : vector<16x32xi32>
      %c0_i32_21 = arith.constant 0 : i32
      %68 = vector.broadcast %c0_i32_21 : i32 to vector<16x32xi32>
      %69 = arith.cmpi slt, %65, %68 : vector<16x32xi32>
      %c0_i32_22 = arith.constant 0 : i32
      %70 = arith.cmpi slt, %63, %c0_i32_22 : i32
      %71 = vector.broadcast %70 : i1 to vector<16x32xi1>
      %72 = vector.broadcast %71 : vector<16x32xi1> to vector<16x32xi1>
      %73 = arith.xori %69, %72 : vector<16x32xi1>
      %74 = arith.andi %73, %67 : vector<16x32xi1>
      %75 = vector.broadcast %63 : i32 to vector<16x32xi32>
      %76 = arith.addi %65, %75 : vector<16x32xi32>
      %77 = arith.select %74, %76, %65 : vector<16x32xi1>, vector<16x32xi32>
      %78 = tpu.iota {dimensions = array<i32: 1>} : vector<16x32xi32>
      %c16_i32_23 = arith.constant 16 : i32
      %c0_i32_24 = arith.constant 0 : i32
      %79 = arith.cmpi eq, %c16_i32_23, %c0_i32_24 : i32
      %c1_i32_25 = arith.constant 1 : i32
      %80 = arith.select %79, %c1_i32_25, %c16_i32_23 : i32
      %81 = vector.broadcast %80 : i32 to vector<16x32xi32>
      %82 = arith.remsi %78, %81 : vector<16x32xi32>
      %c0_i32_26 = arith.constant 0 : i32
      %83 = vector.broadcast %c0_i32_26 : i32 to vector<16x32xi32>
      %84 = arith.cmpi ne, %82, %83 : vector<16x32xi32>
      %c0_i32_27 = arith.constant 0 : i32
      %85 = vector.broadcast %c0_i32_27 : i32 to vector<16x32xi32>
      %86 = arith.cmpi slt, %82, %85 : vector<16x32xi32>
      %c0_i32_28 = arith.constant 0 : i32
      %87 = arith.cmpi slt, %80, %c0_i32_28 : i32
      %88 = vector.broadcast %87 : i1 to vector<16x32xi1>
      %89 = vector.broadcast %88 : vector<16x32xi1> to vector<16x32xi1>
      %90 = arith.xori %86, %89 : vector<16x32xi1>
      %91 = arith.andi %90, %84 : vector<16x32xi1>
      %92 = vector.broadcast %80 : i32 to vector<16x32xi32>
      %93 = arith.addi %82, %92 : vector<16x32xi32>
      %94 = arith.select %91, %93, %82 : vector<16x32xi1>, vector<16x32xi32>
      %c0_i32_29 = arith.constant 0 : i32
      %95 = vector.broadcast %c0_i32_29 : i32 to vector<16x32xi32>
      %96 = arith.cmpi sgt, %77, %95 : vector<16x32xi32>
      %c15_i32 = arith.constant 15 : i32
      %97 = vector.broadcast %c15_i32 : i32 to vector<16x32xi32>
      %98 = arith.cmpi slt, %77, %97 : vector<16x32xi32>
      %99 = arith.andi %96, %98 : vector<16x32xi1>
      %c0_i32_30 = arith.constant 0 : i32
      %100 = vector.broadcast %c0_i32_30 : i32 to vector<16x32xi32>
      %101 = arith.cmpi sgt, %94, %100 : vector<16x32xi32>
      %102 = arith.andi %99, %101 : vector<16x32xi1>
      %c15_i32_31 = arith.constant 15 : i32
      %103 = vector.broadcast %c15_i32_31 : i32 to vector<16x32xi32>
      %104 = arith.cmpi slt, %94, %103 : vector<16x32xi32>
      %105 = arith.andi %102, %104 : vector<16x32xi1>
      %106 = arith.extui %105 : vector<16x32xi1> to vector<16x32xi32>
      %107 = arith.sitofp %106 : vector<16x32xi32> to vector<16x32xf32>
      %c0_32 = arith.constant 0 : index
      %c0_33 = arith.constant 0 : index
      %108 = vector.load %arg5[%c0_32, %c0_33] : memref<16x32xf32, #tpu.memory_space<vmem>>, vector<16x32xf32>
      tpu.vector_store %arg5[%c0_32, %c0_33], %107 {strides = array<i32>} : memref<16x32xf32, #tpu.memory_space<vmem>>, vector<16x32xf32>,
    } else {
    }
    %c0 = arith.constant 0 : index
    %c0_1 = arith.constant 0 : index
    %3 = vector.load %arg2[%c0, %c0_1] : memref<16x32xf32, #tpu.memory_space<vmem>>, vector<16x32xf32>
    %4 = vector.extract_strided_slice %3 {offsets = [0, 31], sizes = [16, 1], strides = [1, 1]} : vector<16x32xf32> to vector<16x1xf32>
    %5 = vector.extract_strided_slice %3 {offsets = [0, 0], sizes = [16, 31], strides = [1, 1]} : vector<16x32xf32> to vector<16x31xf32>
    %6 = tpu.concatenate %4, %5 in 1 : vector<16x1xf32>, vector<16x31xf32> -> vector<16x32xf32>
    %7 = vector.extract_strided_slice %3 {offsets = [0, 1], sizes = [16, 31], strides = [1, 1]} : vector<16x32xf32> to vector<16x31xf32>
    %8 = vector.extract_strided_slice %3 {offsets = [0, 0], sizes = [16, 1], strides = [1, 1]} : vector<16x32xf32> to vector<16x1xf32>
    %9 = tpu.concatenate %7, %8 in 1 : vector<16x31xf32>, vector<16x1xf32> -> vector<16x32xf32>
    %10 = arith.subf %6, %9 : vector<16x32xf32>
    %11 = vector.extract_strided_slice %3 {offsets = [15, 0], sizes = [1, 32], strides = [1, 1]} : vector<16x32xf32> to vector<1x32xf32>
    %12 = vector.extract_strided_slice %3 {offsets = [0, 0], sizes = [15, 32], strides = [1, 1]} : vector<16x32xf32> to vector<15x32xf32>
    %13 = tpu.concatenate %11, %12 in 0 : vector<1x32xf32>, vector<15x32xf32> -> vector<16x32xf32>
    %14 = vector.extract_strided_slice %3 {offsets = [1, 0], sizes = [15, 32], strides = [1, 1]} : vector<16x32xf32> to vector<15x32xf32>
    %15 = vector.extract_strided_slice %3 {offsets = [0, 0], sizes = [1, 32], strides = [1, 1]} : vector<16x32xf32> to vector<1x32xf32>
    %16 = tpu.concatenate %14, %15 in 0 : vector<15x32xf32>, vector<1x32xf32> -> vector<16x32xf32>
    %17 = arith.subf %13, %16 : vector<16x32xf32>
    %18 = arith.mulf %10, %10 : vector<16x32xf32>
    %19 = arith.mulf %17, %17 : vector<16x32xf32>
    %20 = arith.addf %18, %19 : vector<16x32xf32>
    %21 = math.sqrt %20 : vector<16x32xf32>
    %c0_2 = arith.constant 0 : index
    %c0_3 = arith.constant 0 : index
    %22 = vector.load %arg3[%c0_2, %c0_3] : memref<16x32xf32, #tpu.memory_space<vmem>>, vector<16x32xf32>
    %23 = vector.extract_strided_slice %22 {offsets = [0, 31], sizes = [16, 1], strides = [1, 1]} : vector<16x32xf32> to vector<16x1xf32>
    %24 = vector.extract_strided_slice %22 {offsets = [0, 0], sizes = [16, 31], strides = [1, 1]} : vector<16x32xf32> to vector<16x31xf32>
    %25 = tpu.concatenate %23, %24 in 1 : vector<16x1xf32>, vector<16x31xf32> -> vector<16x32xf32>
    %26 = vector.extract_strided_slice %22 {offsets = [0, 1], sizes = [16, 31], strides = [1, 1]} : vector<16x32xf32> to vector<16x31xf32>
    %27 = vector.extract_strided_slice %22 {offsets = [0, 0], sizes = [16, 1], strides = [1, 1]} : vector<16x32xf32> to vector<16x1xf32>
    %28 = tpu.concatenate %26, %27 in 1 : vector<16x31xf32>, vector<16x1xf32> -> vector<16x32xf32>
    %29 = arith.subf %25, %28 : vector<16x32xf32>
    %30 = vector.extract_strided_slice %22 {offsets = [15, 0], sizes = [1, 32], strides = [1, 1]} : vector<16x32xf32> to vector<1x32xf32>
    %31 = vector.extract_strided_slice %22 {offsets = [0, 0], sizes = [15, 32], strides = [1, 1]} : vector<16x32xf32> to vector<15x32xf32>
    %32 = tpu.concatenate %30, %31 in 0 : vector<1x32xf32>, vector<15x32xf32> -> vector<16x32xf32>
    %33 = vector.extract_strided_slice %22 {offsets = [1, 0], sizes = [15, 32], strides = [1, 1]} : vector<16x32xf32> to vector<15x32xf32>
    %34 = vector.extract_strided_slice %22 {offsets = [0, 0], sizes = [1, 32], strides = [1, 1]} : vector<16x32xf32> to vector<1x32xf32>
    %35 = tpu.concatenate %33, %34 in 0 : vector<15x32xf32>, vector<1x32xf32> -> vector<16x32xf32>
    %36 = arith.subf %32, %35 : vector<16x32xf32>
    %37 = arith.mulf %29, %29 : vector<16x32xf32>
    %38 = arith.mulf %36, %36 : vector<16x32xf32>
    %39 = arith.addf %37, %38 : vector<16x32xf32>
    %40 = math.sqrt %39 : vector<16x32xf32>
    %41 = arith.subf %21, %40 : vector<16x32xf32>
    %42 = math.absf %41 : vector<16x32xf32>
    %cst = arith.constant 1.000000e+00 : f32
    %43 = vector.broadcast %cst : f32 to vector<16x32xf32>
    %44 = arith.cmpf olt, %42, %43 : vector<16x32xf32>
    %cst_4 = arith.constant 5.000000e-01 : f32
    %45 = vector.broadcast %cst_4 : f32 to vector<16x32xf32>
    %46 = arith.mulf %45, %41 : vector<16x32xf32>
    %47 = arith.mulf %46, %41 : vector<16x32xf32>
    %cst_5 = arith.constant 5.000000e-01 : f32
    %48 = vector.broadcast %cst_5 : f32 to vector<16x32xf32>
    %49 = arith.subf %42, %48 : vector<16x32xf32>
    %50 = arith.select %44, %47, %49 : vector<16x32xi1>, vector<16x32xf32>
    %c0_6 = arith.constant 0 : index
    %c0_7 = arith.constant 0 : index
    %51 = vector.load %arg5[%c0_6, %c0_7] : memref<16x32xf32, #tpu.memory_space<vmem>>, vector<16x32xf32>
    %52 = arith.mulf %50, %51 : vector<16x32xf32>
    %53 = vector.shape_cast %52 : vector<16x32xf32> to vector<2x8x32xf32>
    %cst_8 = arith.constant dense<0.000000e+00> : vector<8x32xf32>
    %54 = vector.multi_reduction <add>, %53, %cst_8 [0] : vector<2x8x32xf32> to vector<8x32xf32>
    %c0_9 = arith.constant 0 : index
    %c0_10 = arith.constant 0 : index
    %c0_11 = arith.constant 0 : index
    %55 = vector.load %arg4[%c0_9, %c0_10, %c0_11] : memref<1x8x32xf32, #tpu.memory_space<vmem>>, vector<1x8x32xf32>
    %56 = vector.shape_cast %54 : vector<8x32xf32> to vector<1x8x32xf32>
    %57 = arith.addf %55, %56 : vector<1x8x32xf32>
    %c0_12 = arith.constant 0 : index
    %c0_13 = arith.constant 0 : index
    %c0_14 = arith.constant 0 : index
    %58 = vector.load %arg4[%c0_12, %c0_13, %c0_14] : memref<1x8x32xf32, #tpu.memory_space<vmem>>, vector<1x8x32xf32>
    tpu.vector_store %arg4[%c0_12, %c0_13, %c0_14], %57 {strides = array<i32>} : memref<1x8x32xf32, #tpu.memory_space<vmem>>, vector<1x8x32xf32>,
    return
  }
  func.func @transform_0(%arg0: i32, %arg1: i32) -> (i32, i32) {
    %c1_i32 = arith.constant 1 : i32
    %0 = arith.muli %arg0, %c1_i32 : i32
    %1 = arith.addi %0, %arg1 : i32
    %c0_i32 = arith.constant 0 : i32
    %c0_i32_0 = arith.constant 0 : i32
    return %1, %c0_i32 : i32, i32
  }
  func.func @transform_1(%arg0: i32, %arg1: i32) -> (i32, i32) {
    %c1_i32 = arith.constant 1 : i32
    %0 = arith.muli %arg0, %c1_i32 : i32
    %1 = arith.addi %0, %arg1 : i32
    %c0_i32 = arith.constant 0 : i32
    %c0_i32_0 = arith.constant 0 : i32
    return %1, %c0_i32 : i32, i32
  }
  func.func @transform_2(%arg0: i32, %arg1: i32) -> (i32, i32, i32) {
    %c0_i32 = arith.constant 0 : i32
    %c0_i32_0 = arith.constant 0 : i32
    %c0_i32_1 = arith.constant 0 : i32
    return %arg0, %c0_i32, %c0_i32_0 : i32, i32, i32
  }
}

</mosaic_0001>

<bundles_post_ra>
// kernel: tpu_custom_call.1
= control target key start
LH: loop header
LB: loop body
LE: loop exit
PB: predicated region body
PF: predicated region fallthrough
CT: control target
= control target key end

     0   :  { %7 = vsyncpa [#allocation4], 0  ;;  %s496_s0 = inlined_call_operand.hbm [shape: f32[16,32], index: 0, kind: input, shape index: {}]   ;;  %s497_s1 = inlined_call_operand.hbm [shape: f32[16,32], index: 1, kind: input, shape index: {}]   ;;  %s498_s2 = inlined_call_operand.hbm [shape: f32[1,8,32], index: 2, kind: output, shape index: {}]  }
   0x1   :  { %8 = vsyncpa [#allocation7], 0 }
   0x2   :  { %9 = vsyncpa [#allocation5], 0  ;;  %s396_s9 = smov [#allocation3]   ;;  %s324_s13 = scalar_lea.hbm %s496_s0, 256 }
   0x3   :  { %s19_s10 = sshll.u32 %s396_s9, 4  ;;  %p325_p0 = scmp.ne.s32.totalorder %s496_s0, %s324_s13  ;;  %s20_s10 = int_to_ptr.vmem [resolvable:$true] %s19_s10 }
   0x4   :  { %p328_p1 = scmp.lt.u32.totalorder %s324_s13, %s496_s0 }
   0x6   :  { %p330_p2 = pnand %p328_p1, %p325_p0 }
   0x8   :  { %333 = shalt.err (!%p330_p2)
}
   0x9   :  { %s334_s18 = scalar_lea.vmem %s20_s10, 256  ;;  %p339_p4 = scmp.lt.s32.totalorder %s20_s10, %s20_s10 }
   0xa   :  { %p335_p3 = scmp.ne.s32.totalorder %s20_s10, %s334_s18  ;;  %p340_p5 = scmp.lt.s32.totalorder %s334_s18, %s334_s18 }
   0xc   :  { %p341_p6 = por %p340_p5, %p339_p4 }
   0xe   :  { %p342_p7 = pnand %p341_p6, %p335_p3 }
  0x10   :  { %345 = shalt.err (!%p342_p7)
}
  0x11   :  { %s397_s19 = smov 128   ;;  %s398_s20 = smov 8  }
  0x12   :  { %25 = dma.hbm_to_vmem [thread:$0]  %s496_s0, 256, %s20_s10, [#allocation4], %s397_s19, %s397_s19, %s398_s20  }
  0x13   :  { %s399_s23 = smov [#allocation6]   ;;  %s346_s27 = scalar_lea.hbm %s497_s1, 256 }
  0x14   :  { %s35_s24 = sshll.u32 %s399_s23, 4  ;;  %p347_p8 = scmp.ne.s32.totalorder %s497_s1, %s346_s27  ;;  %s36_s24 = int_to_ptr.vmem [resolvable:$true] %s35_s24 }
  0x15   :  { %p350_p9 = scmp.lt.u32.totalorder %s346_s27, %s497_s1 }
  0x17   :  { %p352_p10 = pnand %p350_p9, %p347_p8 }
  0x19   :  { %355 = shalt.err (!%p352_p10)
}
  0x1a   :  { %s356_s4 = scalar_lea.vmem %s36_s24, 256  ;;  %p361_p12 = scmp.lt.s32.totalorder %s36_s24, %s36_s24 }
  0x1b   :  { %p357_p11 = scmp.ne.s32.totalorder %s36_s24, %s356_s4  ;;  %p362_p13 = scmp.lt.s32.totalorder %s356_s4, %s356_s4 }
  0x1d   :  { %p363_p0 = por %p362_p13, %p361_p12 }
  0x1f   :  { %p364_p1 = pnand %p363_p0, %p357_p11 }
  0x21   :  { %367 = shalt.err (!%p364_p1)
}
  0x22   :  { %41 = dma.hbm_to_vmem [thread:$0]  %s497_s1, 256, %s36_s24, [#allocation7], %s397_s19, %s397_s19, %s398_s20  }
  0x23   :  { %390 = dma.done.wait [#allocation4], 256  }
  0x24   :  { %391 = vsyncadd [#allocation4], 4294967040 }
  0x25   :  { %392 = dma.done.wait [#allocation7], 256  }
  0x26   :  { %393 = vsyncadd [#allocation7], 4294967040  ;;  %v117_v0 = vld [vmem:[#allocation3] sm:$0xff]  ;;  %v118_v1 = vld [vmem:[#allocation3 + $0x8] sm:$0xff]  ;;  %vm155_vm0 = vcmask 1040384   ;;  %vm161_vm1 = vcmask 1046528   ;;  %v58_v24 = vlaneseq }
  0x27   :  { %s400_s6 = smov 1   ;;  %s401_s7 = smov 97   ;;  %v153_v2 = vrot.slane %v118_v1, 7  ;;  %v163_v3 = vrot.slane %v118_v1, 1  ;;  %v156_v4 = vrot.slane %v117_v0, 7  ;;  %v162_v5 = vrot.slane %v117_v0, 1 }
  0x28   :  { %127 = vrot.lane.b32.xlu1 %v117_v0, %s400_s6  ;;  %121 = vrot.lane.b32.xlu0 %v117_v0, %s401_s7  ;;  %s402_s1 = smov 127   ;;  %s403_s8 = smov 31   ;;  %v192_v12 = vld [vmem:[#allocation6 + $0x8] sm:$0xff]  ;;  %v191_v13 = vld [vmem:[#allocation6] sm:$0xff]  ;;  %v59_v25 = vshrl.u32 %v58_v24, 7  ;;  %v86_v27 = vand.u32 127, %v58_v24 }
  0x29   :  { %v157_v6 = vsel %vm155_vm0, %v156_v4, %v153_v2  ;;  %v168_v7 = vsel %vm161_vm1, %v163_v3, %v162_v5  ;;  %v160_v8 = vsel %vm155_vm0, %v153_v2, %v156_v4  ;;  %v164_v9 = vsel %vm161_vm1, %v162_v5, %v163_v3  ;;  %s405_s9 = smov [#allocation8]  }
  0x2a   :  { %v450_v10 = vsub.f32 %v157_v6, %v168_v7  ;;  %v452_v11 = vsub.f32 %v160_v8, %v164_v9  ;;  %v225_v14 = vrot.slane %v192_v12, 7  ;;  %v227_v15 = vrot.slane %v191_v13, 7  ;;  %s292_s10 = sshll.u32 %s405_s9, 4  ;;  %s293_s10 = int_to_ptr.vmem [resolvable:$true] %s292_s10 }
  0x2b   :  { %v232_v16 = vrot.slane %v191_v13, 1  ;;  %v233_v17 = vrot.slane %v192_v12, 1  ;;  %v60_v26 = vadd.s32 8, %v59_v25  ;;  %v65_v28 = vand.u32 15, %v59_v25  ;;  %s368_s11 = scalar_lea.vmem %s293_s10, 128  ;;  %p373_p3 = scmp.lt.s32.totalorder %s293_s10, %s293_s10 }
  0x2c   :  { %129 = vrot.lane.b32.xlu1 %v118_v1, %s400_s6  ;;  %123 = vrot.lane.b32.xlu0 %v118_v1, %s401_s7  ;;  %v228_v18 = vsel %vm155_vm0, %v227_v15, %v225_v14  ;;  %v231_v20 = vsel %vm155_vm0, %v225_v14, %v227_v15  ;;  %v91_v30 = vand.u32 15, %v86_v27  ;;  %vm56_vm8 = vcmask 261120   ;;  %p369_p2 = scmp.ne.s32.totalorder %s293_s10, %s368_s11  ;;  %p374_p4 = scmp.lt.s32.totalorder %s368_s11, %s368_s11 }
  0x2d   :  { %v238_v19 = vsel %vm161_vm1, %v233_v17, %v232_v16  ;;  %v234_v22 = vsel %vm161_vm1, %v232_v16, %v233_v17  ;;  %v72_v29 = vand.u32 15, %v60_v26  ;;  %vm99_vm2 = vcmp.gt.s32.totalorder %v65_v28, 0 }
  0x2e   :  { %v240_v21 = vsub.f32 %v228_v18, %v238_v19  ;;  %v459_v23 = vsub.f32 %v231_v20, %v234_v22  ;;  %vm105_vm4 = vcmp.gt.s32.totalorder %v91_v30, 0  ;;  %vm108_vm6 = vcmp.lt.s32.totalorder %v91_v30, 15  ;;  %p375_p5 = por %p374_p4, %p373_p3 }
  0x2f   :  { %vm102_vm3 = vcmp.lt.s32.totalorder %v72_v29, 15  ;;  %vm106_vm5 = vmand %vm99_vm2, %vm105_vm4  ;;  %v404_v31 = vmov 0.0   ;;  %vm148_vm11 = vcmask 252928   ;;  %vm133_vm12 = vcmask 7168  }
  0x30   :  { %138 = vrot.lane.b32.xlu1 %v118_v1, %s402_s1  ;;  %136 = vrot.lane.b32.xlu0 %v117_v0, %s402_s1  ;;  %vm107_vm7 = vmand %vm102_vm3, %vm105_vm4  ;;  %57 = vst.msk [vmem:[#allocation8] sm:$0xff] %vm56_vm8, %v404_v31  ;;  %v174_v53 = vmul.f32 %v450_v10, %v450_v10  ;;  %v173_v55 = vmul.f32 %v452_v11, %v452_v11  ;;  %p376_p6 = pnand %p375_p5, %p369_p2 }
  0x31   :  { %vm109_vm9 = vmand %vm106_vm5, %vm108_vm6  ;;  %v244_v60 = vmul.f32 %v240_v21, %v240_v21  ;;  %v243_v4 = vmul.f32 %v459_v23, %v459_v23 }
  0x32   :  { %vm110_vm10 = vmand %vm107_vm7, %vm108_vm6  ;;  %v302_v32 = vsel %vm109_vm9, 1.0, %v404_v31 }
  0x33   :  { %v303_v33 = vsel %vm110_vm10, 1.0, %v404_v31  ;;  %115 = vst.msk [vmem:[#allocation2] sm:$0xff] %vm56_vm8, %v302_v32 }
  0x34   :  { %144 = vrot.lane.b32.xlu1 %v118_v1, %s403_s8  ;;  %142 = vrot.lane.b32.xlu0 %v117_v0, %s403_s8  ;;  %116 = vst.msk [vmem:[#allocation2 + $0x8] sm:$0xff] %vm56_vm8, %v303_v33 }
  0x38   :  { %197 = vrot.lane.b32.xlu1 %v192_v12, %s401_s7  ;;  %195 = vrot.lane.b32.xlu0 %v191_v13, %s401_s7 }
  0x3c   :  { %203 = vrot.lane.b32.xlu1 %v192_v12, %s400_s6  ;;  %201 = vrot.lane.b32.xlu0 %v191_v13, %s400_s6 }
  0x40   :  { %211 = vrot.lane.b32.xlu1 %v192_v12, %s402_s1  ;;  %209 = vrot.lane.b32.xlu0 %v191_v13, %s402_s1 }
  0x44   :  { %217 = vrot.lane.b32.xlu1 %v192_v12, %s403_s8  ;;  %215 = vrot.lane.b32.xlu0 %v191_v13, %s403_s8 }
  0x9a   :  { %v128_v34 = vpop.permute.xlu1 %127  ;;  %v122_v35 = vpop.permute.xlu0 %121 }
  0x9b   :  { %v134_v47 = vsel %vm133_vm12, %v122_v35, %v128_v34 }
  0x9e   :  { %v130_v36 = vpop.permute.xlu1 %129  ;;  %v124_v37 = vpop.permute.xlu0 %123 }
  0x9f   :  { %v135_v46 = vsel %vm133_vm12, %v124_v37, %v130_v36 }
  0xa2   :  { %v139_v38 = vpop.permute.xlu1 %138  ;;  %v137_v39 = vpop.permute.xlu0 %136 }
  0xa6   :  { %v145_v40 = vpop.permute.xlu1 %144  ;;  %v143_v41 = vpop.permute.xlu0 %142 }
  0xa7   :  { %v150_v42 = vsel %vm148_vm11, %v139_v38, %v145_v40  ;;  %v149_v43 = vsel %vm148_vm11, %v137_v39, %v143_v41  ;;  %v276_v38 = vld [vmem:[#allocation2 + $0x8] sm:$0xff]  ;;  %v275_v41 = vld [vmem:[#allocation2] sm:$0xff] }
  0xa8   :  { %v152_v48 = vsub.f32 %v135_v46, %v150_v42  ;;  %v151_v49 = vsub.f32 %v134_v47, %v149_v43 }
  0xaa   :  { %v198_v44 = vpop.permute.xlu1 %197  ;;  %v196_v45 = vpop.permute.xlu0 %195  ;;  %v172_v52 = vmul.f32 %v152_v48, %v152_v48  ;;  %v171_v54 = vmul.f32 %v151_v49, %v151_v49  ;;  %v283_v48 = vld [vmem:[#allocation8] sm:$0xff] }
  0xac   :  { %v176_v58 = vadd.f32 %v174_v53, %v172_v52  ;;  %v175_v59 = vadd.f32 %v173_v55, %v171_v54 }
  0xae   :  { %v204_v50 = vpop.permute.xlu1 %203  ;;  %v202_v51 = vpop.permute.xlu0 %201  ;;  %316 = vrsqrt.f32 %v176_v58  ;;  %vm186_vm13 = vcmp.eq.f32.partialorder %v176_v58, inf  ;;  %vm188_vm14 = vcmp.eq.f32.partialorder %v176_v58, 0.0  ;;  %v189_v15 = vand.u32 2147483648, %v176_v58 }
  0xaf   :  { %v208_v63 = vsel %vm133_vm12, %v198_v44, %v204_v50  ;;  %v207_v0 = vsel %vm133_vm12, %v196_v45, %v202_v51  ;;  %318 = vrsqrt.f32 %v175_v59  ;;  %vm179_vm15 = vcmp.eq.f32.partialorder %v175_v59, inf }
  0xb0   :  { %vm181_vm0 = vcmp.eq.f32.partialorder %v175_v59, 0.0  ;;  %v182_v18 = vand.u32 2147483648, %v175_v59 }
  0xb2   :  { %v212_v56 = vpop.permute.xlu1 %211  ;;  %v210_v57 = vpop.permute.xlu0 %209 }
  0xb6   :  { %v218_v61 = vpop.permute.xlu1 %217  ;;  %v216_v62 = vpop.permute.xlu0 %215 }
  0xb7   :  { %v222_v1 = vsel %vm148_vm11, %v212_v56, %v218_v61  ;;  %v221_v2 = vsel %vm148_vm11, %v210_v57, %v216_v62 }
  0xb8   :  { %v224_v3 = vsub.f32 %v208_v63, %v222_v1  ;;  %v223_v5 = vsub.f32 %v207_v0, %v221_v2  ;;  %v317_v10 = vpop.eup %316 }
  0xb9   :  { %v319_v11 = vpop.eup %318  ;;  %v185_v12 = vmul.f32 %v317_v10, %v176_v58 }
  0xba   :  { %v242_v6 = vmul.f32 %v224_v3, %v224_v3  ;;  %v241_v7 = vmul.f32 %v223_v5, %v223_v5  ;;  %v178_v13 = vmul.f32 %v319_v11, %v175_v59 }
  0xbb   :  { %v187_v17 = vsel %vm186_vm13, %v176_v58, %v185_v12 }
  0xbc   :  { %v246_v8 = vadd.f32 %v244_v60, %v242_v6  ;;  %v245_v9 = vadd.f32 %v243_v4, %v241_v7  ;;  %v180_v20 = vsel %vm179_vm15, %v175_v59, %v178_v13  ;;  %v190_v26 = vsel %vm188_vm14, %v189_v15, %v187_v17 }
  0xbd   :  { %v183_v28 = vsel %vm181_vm0, %v182_v18, %v180_v20 }
  0xbe   :  { %320 = vrsqrt.f32 %v246_v8  ;;  %vm256_vm1 = vcmp.eq.f32.partialorder %v246_v8, inf  ;;  %v259_v21 = vand.u32 2147483648, %v246_v8  ;;  %vm258_vm2 = vcmp.eq.f32.partialorder %v246_v8, 0.0 }
  0xbf   :  { %322 = vrsqrt.f32 %v245_v9  ;;  %vm249_vm3 = vcmp.eq.f32.partialorder %v245_v9, inf  ;;  %v252_v24 = vand.u32 2147483648, %v245_v9  ;;  %vm251_vm4 = vcmp.eq.f32.partialorder %v245_v9, 0.0 }
  0xc8   :  { %v321_v14 = vpop.eup %320 }
  0xc9   :  { %v323_v16 = vpop.eup %322  ;;  %v255_v19 = vmul.f32 %v321_v14, %v246_v8 }
  0xca   :  { %v248_v22 = vmul.f32 %v323_v16, %v245_v9 }
  0xcb   :  { %v257_v23 = vsel %vm256_vm1, %v246_v8, %v255_v19 }
  0xcc   :  { %v250_v25 = vsel %vm249_vm3, %v245_v9, %v248_v22  ;;  %v260_v27 = vsel %vm258_vm2, %v259_v21, %v257_v23 }
  0xcd   :  { %v253_v29 = vsel %vm251_vm4, %v252_v24, %v250_v25  ;;  %v262_v30 = vsub.f32 %v190_v26, %v260_v27 }
  0xce   :  { %v261_v31 = vsub.f32 %v183_v28, %v253_v29 }
  0xcf   :  { %v264_v32 = vand.u32 2147483647, %v262_v30  ;;  %v268_v33 = vmul.f32 0.5, %v262_v30 }
  0xd0   :  { %v263_v34 = vand.u32 2147483647, %v261_v31  ;;  %v267_v35 = vmul.f32 0.5, %v261_v31 }
  0xd1   :  { %vm266_vm5 = vcmp.lt.f32.partialorder %v264_v32, 1.0  ;;  %v270_v36 = vmul.f32 %v268_v33, %v262_v30  ;;  %v305_v37 = vadd.f32 -0.5, %v264_v32 }
  0xd2   :  { %vm265_vm6 = vcmp.lt.f32.partialorder %v263_v34, 1.0  ;;  %v269_v39 = vmul.f32 %v267_v35, %v261_v31  ;;  %v304_v40 = vadd.f32 -0.5, %v263_v34 }
  0xd3   :  { %v274_v42 = vsel %vm266_vm5, %v270_v36, %v305_v37 }
  0xd4   :  { %v273_v43 = vsel %vm265_vm6, %v269_v39, %v304_v40  ;;  %v278_v44 = vmul.f32 %v276_v38, %v274_v42 }
  0xd5   :  { %v277_v45 = vmul.f32 %v275_v41, %v273_v43 }
  0xd6   :  { %v281_v46 = vsel %vm56_vm8, %v278_v44, 0.0 }
  0xd7   :  { %v280_v47 = vsel %vm56_vm8, %v277_v45, 0.0 }
  0xd8   :  { %v282_v49 = vadd.f32 %v281_v46, %v280_v47 }
  0xda   :  { %v284_v50 = vadd.f32 %v283_v48, %v282_v49 }
  0xdc   :  { %285 = vst.msk [vmem:[#allocation8] sm:$0xff] %vm56_vm8, %v284_v50 }
  0xdd   :  { %379 = shalt.err (!%p376_p6)
}
  0xde   :  { %s380_s14 = scalar_lea.hbm %s498_s2, 128 }
  0xdf   :  { %p381_p7 = scmp.ne.s32.totalorder %s498_s2, %s380_s14  ;;  %p384_p8 = scmp.lt.u32.totalorder %s380_s14, %s498_s2 }
  0xe1   :  { %p386_p9 = pnand %p384_p8, %p381_p7 }
  0xe3   :  { %389 = shalt.err (!%p386_p9)
}
  0xe4   :  { %295 = dma.vmem_to_hbm [thread:$0]  %s293_s10, 128, %s498_s2, [#allocation5]  }
  0xe5   :  { %394 = dma.done.wait [#allocation5], 128  }
  0xe6   :  { %395 = vsyncadd [#allocation5], 4294967168 }
  0xe7   :  { %299 = vsyncpa [#allocation4], 1 }
  0xe8   :  { %300 = vsyncpa [#allocation7], 1 }
  0xe9   :  { %301 = vsyncpa [#allocation5], 1 }

</bundles_post_ra>
